<compile_context>
chip_gen: v7x
topology: tpu7x:2x2x1
jax: 0.10.0
libtpu: 0.0.40
codegen_flags: <defaults>
</compile_context>

<pallas_src>
import jax
import jax.numpy as jnp
from jax.experimental import pallas as pl
from jax.experimental.pallas import tpu as pltpu


def _round_up(x: int, m: int) -> int:
    return ((x + m - 1) // m) * m


def base_conv_kernel(u_ref, halo_ref, k_ref, wt_ref, b_ref, o_ref, ext_ref):
    # u_ref    : (1, TL, D)   current sequence tile (channels on lanes)
    # halo_ref : (1, H, D)    last H rows of the previous tile (clamped at tile 0; masked below)
    # k_ref    : (Lk, D)      filter, lag-major, channels on lanes
    # wt_ref   : (D, D)       projection weight already transposed (proj = u @ wt), bf16
    # b_ref    : (1, D)       projection bias
    # o_ref    : (1, TL, D)   output tile
    # ext_ref  : (H + TL, D)  VMEM scratch: [halo rows | current tile], H sublane-aligned
    t = pl.program_id(1)
    TL = u_ref.shape[1]
    Lk = k_ref.shape[0]
    H = ext_ref.shape[0] - TL
    D = ext_ref.shape[1]

    u = u_ref[0]                      # (TL, D) f32
    k = k_ref[...]                    # (Lk, D) f32

    # ---- causal depthwise conv: shifted-window FMA into one accumulator ----
    acc = u * k[0:1, :]               # lag 0
    if Lk > 1:
        # Stage [halo | current] once. Tile 0 has no history -> zero the halo rows (pl.when,
        # no full-width multiply).
        @pl.when(t == 0)
        def _():
            ext_ref[0:H, :] = jnp.zeros((H, D), dtype=ext_ref.dtype)

        @pl.when(t > 0)
        def _():
            ext_ref[0:H, :] = halo_ref[0]

        # TODO(synk): the TL-row staging copy below could be removed by splitting each lag into
        # an interior FMA on u directly plus a boundary FMA on the halo rows (few-% win, most
        # relevant on v5e's single vst slot).
        ext_ref[H:H + TL, :] = u

        if Lk <= 32:
            # Short filters: fully unrolled static-slice FMA chain.
            for s in range(1, Lk):
                acc = acc + ext_ref[H - s:H - s + TL, :] * k[s:s + 1, :]
        else:
            # Long filters: chunk-unrolled loop keeps code size / vreg pressure bounded.
            def lag_body(s, a):
                return a + ext_ref[pl.ds(H - s, TL), :] * k_ref[pl.ds(s, 1), :]
            acc = jax.lax.fori_loop(1, Lk, lag_body, acc, unroll=8)

    # ---- linear projection on the MXU: bf16 operands, f32 accumulation ----
    # (documented precision choice; the torch reference Linear is f32)
    proj = jnp.dot(u.astype(jnp.bfloat16), wt_ref[...],
                   preferred_element_type=jnp.float32) + b_ref[...]

    # ---- gate + residual ----
    o_ref[0] = (acc * proj + u).astype(o_ref.dtype)


def base_conv(u, filt, w, b, *, tile_len: int = 512):
    """u: (B, L, D) f32; filt: (D, l_max); w: (D, D) PyTorch Linear weight; b: (D,)."""
    B, L, D = u.shape
    l_max = filt.shape[1]
    # Direct causal conv == fft_conv exactly only when l_max <= seq_len.
    assert l_max <= L, "l_max must be <= seq_len for the direct-form convolution"

    D_pad = _round_up(D, 128)                      # lane-dense channels
    H = max(8, _round_up(l_max - 1, 8))            # sublane-aligned halo rows

    # Per-chip VMEM budget (64 MiB/TC on v7x, 128 MiB on v5e/v6e); leave headroom.
    try:
        vmem_cap = pltpu.get_tpu_info().vmem_capacity_bytes
    except Exception:  # interpret mode / unknown chip
        vmem_cap = 64 * 1024 * 1024

    def vmem_est(tl):
        return (2 * 2 * tl * D_pad * 4             # u + out tiles, double-buffered
                + 2 * H * D_pad * 4                # halo rows, double-buffered
                + D_pad * D_pad * 2                # weight (bf16), single-buffered
                + l_max * D_pad * 4 + D_pad * 4    # filter + bias, single-buffered
                + (H + tl) * D_pad * 4)            # ext scratch

    # H must divide TL so the halo block (elements [ti*TL - H, ti*TL)) lands on an H boundary.
    TL = min(_round_up(L, H), _round_up(max(tile_len, l_max), H))
    budget = max(32 * 1024 * 1024, int(0.7 * vmem_cap))
    while vmem_est(TL) > budget and TL > max(H, 128):
        TL = max(_round_up(TL // 2, H), H)
    assert H <= TL, "halo must fit inside one sequence tile"

    L_pad = _round_up(L, TL)
    blocks_per_tile = TL // H

    # Skip full-array pad/slice copies when shapes are already aligned (common D%128==0 case).
    pad_seq, pad_ch = L_pad - L, D_pad - D
    u_p = jnp.pad(u, ((0, 0), (0, pad_seq), (0, pad_ch))) if (pad_seq or pad_ch) else u
    k_t = filt.T.astype(jnp.float32)               # (l_max, D)
    wt = w.T.astype(jnp.float32)                   # (D, D)
    bias = b.astype(jnp.float32)
    if pad_ch:
        k_t = jnp.pad(k_t, ((0, 0), (0, pad_ch)))
        wt = jnp.pad(wt, ((0, pad_ch), (0, pad_ch)))
        bias = jnp.pad(bias, (0, pad_ch))
    wt = wt.astype(jnp.bfloat16)                   # (D_pad, D_pad)
    bias = bias.reshape(1, D_pad)

    grid = (B, L_pad // TL)
    vmem_limit = int(min(max(32 * 1024 * 1024, 2 * vmem_est(TL)), int(0.85 * vmem_cap)))

    out = pl.pallas_call(
        base_conv_kernel,
        out_shape=jax.ShapeDtypeStruct((B, L_pad, D_pad), u.dtype),
        grid=grid,
        in_specs=[
            pl.BlockSpec((1, TL, D_pad), lambda bi, ti: (bi, ti, 0)),
            # H-row causal halo: last H rows of the previous tile (clamped at tile 0 and masked
            # inside the kernel) instead of re-fetching a full TL-row tile from HBM.
            pl.BlockSpec((1, H, D_pad),
                         lambda bi, ti: (bi, jnp.maximum(ti * blocks_per_tile - 1, 0), 0)),
            # Grid-invariant operands: single-buffered (constant index_map).
            pl.BlockSpec((l_max, D_pad), lambda bi, ti: (0, 0),
                         pipeline_mode=pl.Buffered(1)),
            pl.BlockSpec((D_pad, D_pad), lambda bi, ti: (0, 0),
                         pipeline_mode=pl.Buffered(1)),
            pl.BlockSpec((1, D_pad), lambda bi, ti: (0, 0),
                         pipeline_mode=pl.Buffered(1)),
        ],
        out_specs=pl.BlockSpec((1, TL, D_pad), lambda bi, ti: (bi, ti, 0)),
        scratch_shapes=[pltpu.VMEM((H + TL, D_pad), jnp.float32)],
        compiler_params=pltpu.CompilerParams(
            dimension_semantics=("parallel", "parallel"),
            vmem_limit_bytes=vmem_limit,
        ),
    )(u_p, u_p, k_t, wt, bias)

    if pad_seq or pad_ch:
        out = out[:, :L, :D]
    return out


# ---------------------------- pure-JAX reference ----------------------------
def fft_conv_ref(u_bdl, k):
    # u_bdl: (B, D, L), k: (D, l_max)  -- mirrors the PyTorch fft_conv exactly.
    L = u_bdl.shape[-1]
    n = 2 * L
    k_f = jnp.fft.rfft(k, n=n) / n
    u_f = jnp.fft.rfft(u_bdl, n=n)
    y = jnp.fft.irfft(u_f * k_f, n=n, norm="forward")[..., :L]
    return y


def base_conv_ref(u, filt, w, b):
    u_conv = jnp.transpose(fft_conv_ref(jnp.transpose(u, (0, 2, 1)), filt), (0, 2, 1))
    u_proj = u @ w.T + b
    return u_conv * u_proj + u


if __name__ == "__main__":
    B, L, D = 2, 48, 32
    l_max = 16  # short filter (l_max <= seq_len, standard BaseConv config)

    key = jax.random.PRNGKey(0)
    ku, kf, kw, kb = jax.random.split(key, 4)

    u = jax.random.normal(ku, (B, L, D), dtype=jnp.float32)
    filt = jax.random.normal(kf, (D, l_max), dtype=jnp.float32)          # nn.Parameter(randn)
    bound = 1.0 / (D ** 0.5)                                             # Linear-style init
    w = jax.random.uniform(kw, (D, D), minval=-bound, maxval=bound, dtype=jnp.float32)
    b = jax.random.uniform(kb, (D,), minval=-bound, maxval=bound, dtype=jnp.float32)

    y_ref = base_conv_ref(u, filt, w, b)

    # Multi-tile path: grid = (B, 3), H = 16-row causal halos crossing tile boundaries.
    y_tiled = jax.block_until_ready(base_conv(u, filt, w, b, tile_len=16))
    # Default path: a single sequence tile per batch (tile-0 zero-halo branch, H < TL slicing).
    y_single = jax.block_until_ready(base_conv(u, filt, w, b))

    for y in (y_tiled, y_single):
        assert y.shape == (B, L, D)
        err = float(jnp.max(jnp.abs(y - y_ref)))
        # bf16 MXU operands (f32 accumulation) -> slightly wider tolerance than pure-f32 matmul.
        assert jnp.allclose(y, y_ref, atol=5e-2, rtol=5e-2), err

    print("KERNEL_OK")
</pallas_src>

<mosaic_0001>
module attributes {stable_mosaic.version = 11 : i64} {
  func.func @base_conv_kernel(%arg0: i32, %arg1: i32, %arg2: memref<1x16x128xf32, #tpu.memory_space<vmem>>, %arg3: memref<1x16x128xf32, #tpu.memory_space<vmem>>, %arg4: memref<16x128xf32, #tpu.memory_space<vmem>>, %arg5: memref<128x128xbf16, #tpu.memory_space<vmem>>, %arg6: memref<1x128xf32, #tpu.memory_space<vmem>>, %arg7: memref<1x16x128xf32, #tpu.memory_space<vmem>>, %arg8: memref<32x128xf32, #tpu.memory_space<vmem>>) attributes {dimension_semantics = [#tpu.dimension_semantics<parallel>, #tpu.dimension_semantics<parallel>], iteration_bounds = array<i64: 2, 3>, scalar_prefetch = 0 : i64, scratch_operands = 1 : i64, tpu.core_type = #tpu.core_type<tc>, window_params = [{transform_indices = @transform_0, window_bounds = array<i64: 1, 16, 128>}, {transform_indices = @transform_1, window_bounds = array<i64: 1, 16, 128>}, {pipeline_mode = #tpu.pipeline_mode<synchronous>, transform_indices = @transform_2, window_bounds = array<i64: 16, 128>}, {pipeline_mode = #tpu.pipeline_mode<synchronous>, transform_indices = @transform_3, window_bounds = array<i64: 128, 128>}, {pipeline_mode = #tpu.pipeline_mode<synchronous>, transform_indices = @transform_4, window_bounds = array<i64: 1, 128>}, {transform_indices = @transform_5, window_bounds = array<i64: 1, 16, 128>}]} {
    %c0 = arith.constant 0 : index
    %c0_0 = arith.constant 0 : index
    %c0_1 = arith.constant 0 : index
    %0 = vector.load %arg2[%c0, %c0_0, %c0_1] : memref<1x16x128xf32, #tpu.memory_space<vmem>>, vector<1x16x128xf32>
    %1 = vector.shape_cast %0 : vector<1x16x128xf32> to vector<16x128xf32>
    %c0_2 = arith.constant 0 : index
    %c0_3 = arith.constant 0 : index
    %2 = vector.load %arg4[%c0_2, %c0_3] : memref<16x128xf32, #tpu.memory_space<vmem>>, vector<16x128xf32>
    %3 = vector.extract_strided_slice %2 {offsets = [0, 0], sizes = [1, 128], strides = [1, 1]} : vector<16x128xf32> to vector<1x128xf32>
    %4 = vector.broadcast %3 : vector<1x128xf32> to vector<16x128xf32>
    %5 = arith.mulf %1, %4 : vector<16x128xf32>
    %c0_i32 = arith.constant 0 : i32
    %6 = arith.cmpi eq, %arg1, %c0_i32 : i32
    %7 = arith.extui %6 : i1 to i32
    %c0_i32_4 = arith.constant 0 : i32
    %8 = arith.cmpi ne, %7, %c0_i32_4 : i32
    scf.if %8 {
      %cst_30 = arith.constant 0.000000e+00 : f32
      %99 = vector.broadcast %cst_30 : f32 to vector<16x128xf32>
      %c0_31 = arith.constant 0 : index
      %c0_32 = arith.constant 0 : index
      %100 = vector.load %arg8[%c0_31, %c0_32] : memref<32x128xf32, #tpu.memory_space<vmem>>, vector<16x128xf32>
      tpu.vector_store %arg8[%c0_31, %c0_32], %99 {strides = array<i32>} : memref<32x128xf32, #tpu.memory_space<vmem>>, vector<16x128xf32>,
    } else {
    }
    %c0_i32_5 = arith.constant 0 : i32
    %9 = arith.cmpi sgt, %arg1, %c0_i32_5 : i32
    %10 = arith.extui %9 : i1 to i32
    %c0_i32_6 = arith.constant 0 : i32
    %11 = arith.cmpi ne, %10, %c0_i32_6 : i32
    scf.if %11 {
      %c0_30 = arith.constant 0 : index
      %c0_31 = arith.constant 0 : index
      %c0_32 = arith.constant 0 : index
      %99 = vector.load %arg3[%c0_30, %c0_31, %c0_32] : memref<1x16x128xf32, #tpu.memory_space<vmem>>, vector<1x16x128xf32>
      %100 = vector.shape_cast %99 : vector<1x16x128xf32> to vector<16x128xf32>
      %c0_33 = arith.constant 0 : index
      %c0_34 = arith.constant 0 : index
      %101 = vector.load %arg8[%c0_33, %c0_34] : memref<32x128xf32, #tpu.memory_space<vmem>>, vector<16x128xf32>
      tpu.vector_store %arg8[%c0_33, %c0_34], %100 {strides = array<i32>} : memref<32x128xf32, #tpu.memory_space<vmem>>, vector<16x128xf32>,
    } else {
    }
    %c16 = arith.constant 16 : index
    %c0_7 = arith.constant 0 : index
    %12 = vector.load %arg8[%c16, %c0_7] : memref<32x128xf32, #tpu.memory_space<vmem>>, vector<16x128xf32>
    tpu.vector_store %arg8[%c16, %c0_7], %1 {strides = array<i32>} : memref<32x128xf32, #tpu.memory_space<vmem>>, vector<16x128xf32>,
    %c15 = arith.constant 15 : index
    %c0_8 = arith.constant 0 : index
    %13 = vector.load %arg8[%c15, %c0_8] : memref<32x128xf32, #tpu.memory_space<vmem>>, vector<16x128xf32>
    %14 = vector.extract_strided_slice %2 {offsets = [1, 0], sizes = [1, 128], strides = [1, 1]} : vector<16x128xf32> to vector<1x128xf32>
    %15 = vector.broadcast %14 : vector<1x128xf32> to vector<16x128xf32>
    %16 = arith.mulf %13, %15 : vector<16x128xf32>
    %17 = arith.addf %5, %16 : vector<16x128xf32>
    %c14 = arith.constant 14 : index
    %c0_9 = arith.constant 0 : index
    %18 = vector.load %arg8[%c14, %c0_9] : memref<32x128xf32, #tpu.memory_space<vmem>>, vector<16x128xf32>
    %19 = vector.extract_strided_slice %2 {offsets = [2, 0], sizes = [1, 128], strides = [1, 1]} : vector<16x128xf32> to vector<1x128xf32>
    %20 = vector.broadcast %19 : vector<1x128xf32> to vector<16x128xf32>
    %21 = arith.mulf %18, %20 : vector<16x128xf32>
    %22 = arith.addf %17, %21 : vector<16x128xf32>
    %c13 = arith.constant 13 : index
    %c0_10 = arith.constant 0 : index
    %23 = vector.load %arg8[%c13, %c0_10] : memref<32x128xf32, #tpu.memory_space<vmem>>, vector<16x128xf32>
    %24 = vector.extract_strided_slice %2 {offsets = [3, 0], sizes = [1, 128], strides = [1, 1]} : vector<16x128xf32> to vector<1x128xf32>
    %25 = vector.broadcast %24 : vector<1x128xf32> to vector<16x128xf32>
    %26 = arith.mulf %23, %25 : vector<16x128xf32>
    %27 = arith.addf %22, %26 : vector<16x128xf32>
    %c12 = arith.constant 12 : index
    %c0_11 = arith.constant 0 : index
    %28 = vector.load %arg8[%c12, %c0_11] : memref<32x128xf32, #tpu.memory_space<vmem>>, vector<16x128xf32>
    %29 = vector.extract_strided_slice %2 {offsets = [4, 0], sizes = [1, 128], strides = [1, 1]} : vector<16x128xf32> to vector<1x128xf32>
    %30 = vector.broadcast %29 : vector<1x128xf32> to vector<16x128xf32>
    %31 = arith.mulf %28, %30 : vector<16x128xf32>
    %32 = arith.addf %27, %31 : vector<16x128xf32>
    %c11 = arith.constant 11 : index
    %c0_12 = arith.constant 0 : index
    %33 = vector.load %arg8[%c11, %c0_12] : memref<32x128xf32, #tpu.memory_space<vmem>>, vector<16x128xf32>
    %34 = vector.extract_strided_slice %2 {offsets = [5, 0], sizes = [1, 128], strides = [1, 1]} : vector<16x128xf32> to vector<1x128xf32>
    %35 = vector.broadcast %34 : vector<1x128xf32> to vector<16x128xf32>
    %36 = arith.mulf %33, %35 : vector<16x128xf32>
    %37 = arith.addf %32, %36 : vector<16x128xf32>
    %c10 = arith.constant 10 : index
    %c0_13 = arith.constant 0 : index
    %38 = vector.load %arg8[%c10, %c0_13] : memref<32x128xf32, #tpu.memory_space<vmem>>, vector<16x128xf32>
    %39 = vector.extract_strided_slice %2 {offsets = [6, 0], sizes = [1, 128], strides = [1, 1]} : vector<16x128xf32> to vector<1x128xf32>
    %40 = vector.broadcast %39 : vector<1x128xf32> to vector<16x128xf32>
    %41 = arith.mulf %38, %40 : vector<16x128xf32>
    %42 = arith.addf %37, %41 : vector<16x128xf32>
    %c9 = arith.constant 9 : index
    %c0_14 = arith.constant 0 : index
    %43 = vector.load %arg8[%c9, %c0_14] : memref<32x128xf32, #tpu.memory_space<vmem>>, vector<16x128xf32>
    %44 = vector.extract_strided_slice %2 {offsets = [7, 0], sizes = [1, 128], strides = [1, 1]} : vector<16x128xf32> to vector<1x128xf32>
    %45 = vector.broadcast %44 : vector<1x128xf32> to vector<16x128xf32>
    %46 = arith.mulf %43, %45 : vector<16x128xf32>
    %47 = arith.addf %42, %46 : vector<16x128xf32>
    %c8 = arith.constant 8 : index
    %c0_15 = arith.constant 0 : index
    %48 = vector.load %arg8[%c8, %c0_15] : memref<32x128xf32, #tpu.memory_space<vmem>>, vector<16x128xf32>
    %49 = vector.extract_strided_slice %2 {offsets = [8, 0], sizes = [1, 128], strides = [1, 1]} : vector<16x128xf32> to vector<1x128xf32>
    %50 = vector.broadcast %49 : vector<1x128xf32> to vector<16x128xf32>
    %51 = arith.mulf %48, %50 : vector<16x128xf32>
    %52 = arith.addf %47, %51 : vector<16x128xf32>
    %c7 = arith.constant 7 : index
    %c0_16 = arith.constant 0 : index
    %53 = vector.load %arg8[%c7, %c0_16] : memref<32x128xf32, #tpu.memory_space<vmem>>, vector<16x128xf32>
    %54 = vector.extract_strided_slice %2 {offsets = [9, 0], sizes = [1, 128], strides = [1, 1]} : vector<16x128xf32> to vector<1x128xf32>
    %55 = vector.broadcast %54 : vector<1x128xf32> to vector<16x128xf32>
    %56 = arith.mulf %53, %55 : vector<16x128xf32>
    %57 = arith.addf %52, %56 : vector<16x128xf32>
    %c6 = arith.constant 6 : index
    %c0_17 = arith.constant 0 : index
    %58 = vector.load %arg8[%c6, %c0_17] : memref<32x128xf32, #tpu.memory_space<vmem>>, vector<16x128xf32>
    %59 = vector.extract_strided_slice %2 {offsets = [10, 0], sizes = [1, 128], strides = [1, 1]} : vector<16x128xf32> to vector<1x128xf32>
    %60 = vector.broadcast %59 : vector<1x128xf32> to vector<16x128xf32>
    %61 = arith.mulf %58, %60 : vector<16x128xf32>
    %62 = arith.addf %57, %61 : vector<16x128xf32>
    %c5 = arith.constant 5 : index
    %c0_18 = arith.constant 0 : index
    %63 = vector.load %arg8[%c5, %c0_18] : memref<32x128xf32, #tpu.memory_space<vmem>>, vector<16x128xf32>
    %64 = vector.extract_strided_slice %2 {offsets = [11, 0], sizes = [1, 128], strides = [1, 1]} : vector<16x128xf32> to vector<1x128xf32>
    %65 = vector.broadcast %64 : vector<1x128xf32> to vector<16x128xf32>
    %66 = arith.mulf %63, %65 : vector<16x128xf32>
    %67 = arith.addf %62, %66 : vector<16x128xf32>
    %c4 = arith.constant 4 : index
    %c0_19 = arith.constant 0 : index
    %68 = vector.load %arg8[%c4, %c0_19] : memref<32x128xf32, #tpu.memory_space<vmem>>, vector<16x128xf32>
    %69 = vector.extract_strided_slice %2 {offsets = [12, 0], sizes = [1, 128], strides = [1, 1]} : vector<16x128xf32> to vector<1x128xf32>
    %70 = vector.broadcast %69 : vector<1x128xf32> to vector<16x128xf32>
    %71 = arith.mulf %68, %70 : vector<16x128xf32>
    %72 = arith.addf %67, %71 : vector<16x128xf32>
    %c3 = arith.constant 3 : index
    %c0_20 = arith.constant 0 : index
    %73 = vector.load %arg8[%c3, %c0_20] : memref<32x128xf32, #tpu.memory_space<vmem>>, vector<16x128xf32>
    %74 = vector.extract_strided_slice %2 {offsets = [13, 0], sizes = [1, 128], strides = [1, 1]} : vector<16x128xf32> to vector<1x128xf32>
    %75 = vector.broadcast %74 : vector<1x128xf32> to vector<16x128xf32>
    %76 = arith.mulf %73, %75 : vector<16x128xf32>
    %77 = arith.addf %72, %76 : vector<16x128xf32>
    %c2 = arith.constant 2 : index
    %c0_21 = arith.constant 0 : index
    %78 = vector.load %arg8[%c2, %c0_21] : memref<32x128xf32, #tpu.memory_space<vmem>>, vector<16x128xf32>
    %79 = vector.extract_strided_slice %2 {offsets = [14, 0], sizes = [1, 128], strides = [1, 1]} : vector<16x128xf32> to vector<1x128xf32>
    %80 = vector.broadcast %79 : vector<1x128xf32> to vector<16x128xf32>
    %81 = arith.mulf %78, %80 : vector<16x128xf32>
    %82 = arith.addf %77, %81 : vector<16x128xf32>
    %c1 = arith.constant 1 : index
    %c0_22 = arith.constant 0 : index
    %83 = vector.load %arg8[%c1, %c0_22] : memref<32x128xf32, #tpu.memory_space<vmem>>, vector<16x128xf32>
    %84 = vector.extract_strided_slice %2 {offsets = [15, 0], sizes = [1, 128], strides = [1, 1]} : vector<16x128xf32> to vector<1x128xf32>
    %85 = vector.broadcast %84 : vector<1x128xf32> to vector<16x128xf32>
    %86 = arith.mulf %83, %85 : vector<16x128xf32>
    %87 = arith.addf %82, %86 : vector<16x128xf32>
    %88 = arith.truncf %1 : vector<16x128xf32> to vector<16x128xbf16>
    %c0_23 = arith.constant 0 : index
    %c0_24 = arith.constant 0 : index
    %89 = vector.load %arg5[%c0_23, %c0_24] : memref<128x128xbf16, #tpu.memory_space<vmem>>, vector<128x128xbf16>
    %cst = arith.constant dense<0.000000e+00> : vector<16x128xf32>
    %90 = tpu.matmul %88, %89, %cst {dimension_numbers = #tpu.dot_dimension_numbers<[1], [0], [0], [1], [0, 0, 1, 1], [], []>} : vector<16x128xbf16>, vector<128x128xbf16>, vector<16x128xf32> -> vector<16x128xf32>
    %c0_25 = arith.constant 0 : index
    %c0_26 = arith.constant 0 : index
    %91 = vector.load %arg6[%c0_25, %c0_26] : memref<1x128xf32, #tpu.memory_space<vmem>>, vector<1x128xf32>
    %92 = vector.broadcast %91 : vector<1x128xf32> to vector<16x128xf32>
    %93 = arith.addf %90, %92 : vector<16x128xf32>
    %94 = arith.mulf %87, %93 : vector<16x128xf32>
    %95 = arith.addf %94, %1 : vector<16x128xf32>
    %c0_27 = arith.constant 0 : index
    %c0_28 = arith.constant 0 : index
    %c0_29 = arith.constant 0 : index
    %96 = vector.load %arg7[%c0_27, %c0_28, %c0_29] : memref<1x16x128xf32, #tpu.memory_space<vmem>>, vector<1x16x128xf32>
    %97 = vector.shape_cast %96 : vector<1x16x128xf32> to vector<16x128xf32>
    %98 = vector.shape_cast %95 : vector<16x128xf32> to vector<1x16x128xf32>
    tpu.vector_store %arg7[%c0_27, %c0_28, %c0_29], %98 {strides = array<i32>} : memref<1x16x128xf32, #tpu.memory_space<vmem>>, vector<1x16x128xf32>,
    return
  }
  func.func @transform_0(%arg0: i32, %arg1: i32) -> (i32, i32, i32) {
    %c0_i32 = arith.constant 0 : i32
    %c0_i32_0 = arith.constant 0 : i32
    return %arg0, %arg1, %c0_i32 : i32, i32, i32
  }
  func.func @transform_1(%arg0: i32, %arg1: i32) -> (i32, i32, i32) {
    %c1_i32 = arith.constant 1 : i32
    %0 = arith.muli %arg1, %c1_i32 : i32
    %c1_i32_0 = arith.constant 1 : i32
    %1 = arith.subi %0, %c1_i32_0 : i32
    %c0_i32 = arith.constant 0 : i32
    %2 = arith.maxsi %1, %c0_i32 : i32
    %c0_i32_1 = arith.constant 0 : i32
    %c0_i32_2 = arith.constant 0 : i32
    return %arg0, %2, %c0_i32_1 : i32, i32, i32
  }
  func.func @transform_2(%arg0: i32, %arg1: i32) -> (i32, i32) {
    %c0_i32 = arith.constant 0 : i32
    %c0_i32_0 = arith.constant 0 : i32
    %c0_i32_1 = arith.constant 0 : i32
    return %c0_i32, %c0_i32_0 : i32, i32
  }
  func.func @transform_3(%arg0: i32, %arg1: i32) -> (i32, i32) {
    %c0_i32 = arith.constant 0 : i32
    %c0_i32_0 = arith.constant 0 : i32
    %c0_i32_1 = arith.constant 0 : i32
    return %c0_i32, %c0_i32_0 : i32, i32
  }
  func.func @transform_4(%arg0: i32, %arg1: i32) -> (i32, i32) {
    %c0_i32 = arith.constant 0 : i32
    %c0_i32_0 = arith.constant 0 : i32
    %c0_i32_1 = arith.constant 0 : i32
    return %c0_i32, %c0_i32_0 : i32, i32
  }
  func.func @transform_5(%arg0: i32, %arg1: i32) -> (i32, i32, i32) {
    %c0_i32 = arith.constant 0 : i32
    %c0_i32_0 = arith.constant 0 : i32
    return %arg0, %arg1, %c0_i32 : i32, i32, i32
  }
}

</mosaic_0001>

<bundles_post_ra>
// kernel: tpu_custom_call.1
= control target key start
LH: loop header
LB: loop body
LE: loop exit
PB: predicated region body
PF: predicated region fallthrough
CT: control target
= control target key end

     0   :  { %s1758_s0 = inlined_call_operand.hbm [shape: f32[2,48,128], index: 0, kind: input, shape index: {}]   ;;  %s1759_s1 = inlined_call_operand.hbm [shape: f32[2,48,128], index: 1, kind: input, shape index: {}]   ;;  %s1760_s2 = inlined_call_operand.hbm [shape: f32[16,128], index: 2, kind: input, shape index: {}]   ;;  %s1761_s3 = inlined_call_operand.hbm [shape: bf16[128,128], index: 3, kind: input, shape index: {}]   ;;  %s1762_s4 = inlined_call_operand.vmem [shape: f32[1,128], index: 4, kind: input, shape index: {}]   ;;  %s1763_s5 = inlined_call_operand.hbm [shape: f32[2,48,128], index: 5, kind: output, shape index: {}]  }
   0x1   :  { %1784 = sst [smem:[#allocation27_spill]] %s1758_s0 }
   0x2   :  { %1785 = sst [smem:[#allocation28_spill]] %s1760_s2 }
   0x3   :  { %1786 = sst [smem:[#allocation29_spill]] %s1761_s3 }
   0x4   :  { %1787 = sst [smem:[#allocation30_spill]] %s1762_s4 }
   0x5   :  { %1788 = sst [smem:[#allocation31_spill]] %s1763_s5 }
   0x6   :  { %10 = vsyncpa [#allocation4], 0 }
   0x7   :  { %12 = vsyncpa [#allocation4 + $0x1], 0 }
   0x8   :  { %13 = vsyncpa [#allocation7], 0 }
   0x9   :  { %15 = vsyncpa [#allocation7 + $0x1], 0 }
   0xa   :  { %16 = vsyncpa [#allocation10], 0 }
   0xb   :  { %17 = vsyncpa [#allocation5], 0 }
   0xc   :  { %19 = vsyncpa [#allocation5 + $0x1], 0  ;;  %s1299_s18 = smov 0   ;;  %s1301_s19 = smov 0  }
   0xd   :  { %s1303_s20 = smov 0   ;;  %s1305_s21 = smov 0  }
   0xe   :  { %s1307_s22 = smov 0   ;;  %s1309_s23 = smov 0  }
   0xf   :  { %s1311_s24 = smov 0   ;;  %s1313_s25 = smov 0  }
  0x10   :  { %s1315_s26 = smov 0   ;;  %s1317_s27 = smov 0  }
  0x11   :  { %s1319_s28 = smov 0  }
  0x12 LB: > { %1789 = sst [smem:[#allocation17_spill]] %s1225_s21  ;;  %s1353_s29 = sadd.s32 4294967295, %s1253_s28   ;;  %s1253_s28 = sphi %s1319_s28, %s25_s28   ;;  %s1249_s27 = sphi %s1317_s27, %s1845_s27   ;;  %s1245_s26 = sphi %s1315_s26, %s1837_s26   ;;  %s1241_s25 = sphi %s1313_s25, %s1844_s25   ;;  %s1237_s24 = sphi %s1311_s24, %s1836_s24   ;;  %s1233_s23 = sphi %s1309_s23, %s1835_s23   ;;  %s1229_s22 = sphi %s1307_s22, %s1843_s22   ;;  %s1225_s21 = sphi %s1305_s21, %s1842_s21   ;;  %s1221_s20 = sphi %s1303_s20, %s1841_s20   ;;  %s1217_s19 = sphi %s1301_s19, %s1840_s19   ;;  %s1213_s18 = sphi %s1299_s18, %s1839_s18  }
  0x13   : > { %1790 = sst [smem:[#allocation18_spill]] %s1233_s23  ;;  %s790_s30 = sadd.s32 4294967294, %s1253_s28  }
  0x14   : > { %1791 = sst [smem:[#allocation19_spill]] %s1237_s24  ;;  %p59_p0 = scmp.ne.s32.totalorder %s1229_s22, %s1225_s21 }
  0x15   : > { %1792 = sst [smem:[#allocation20_spill]] %s1241_s25  ;;  %p1765_p1 = scmp.eq.s32.totalorder %s1353_s29, 0 }
  0x16   : > { %1793 = sst [smem:[#allocation21_spill]] %s1245_s26  ;;  %p93_p2 = scmp.ne.s32.totalorder %s1217_s19, %s1213_s18 }
  0x17   : > { %p1363_p4 = por %p1765_p1, %p59_p0  ;;  %p188_p5 = scmp.eq.s32.totalorder %s790_s30, 5 }
  0x18   : > { %p1369_p6 = por %p93_p2, %p1765_p1  ;;  %p793_p7 = scmp.ge.s32.totalorder %s1253_s28, 1 }
  0x19   : > { %s1794_s6 = scalar_select %p1363_p4, 1, 0 }
  0x1a   : > { %s1795_s7 = scalar_select %p1369_p6, 1, 0 }
  0x1b   : > { %p1374_p8 = por %p188_p5, %p59_p0  ;;  %p195_p9 = scmp.lt.s32.totalorder %s1253_s28, 7 }
  0x1c   : > { %s1255_s10 = smov [#allocation8]   ;;  %s1256_s13 = smov [#allocation9]  }
  0x1d   : > { %s1796_s8 = scalar_select %p1374_p8, 1, 0 }
  0x1e   : > { %p1379_p10 = pnand %p793_p7, %p195_p9  ;;  %s207_s11 = sshll.u32 %s1255_s10, 4  ;;  %s208_s11 = int_to_ptr.vmem [resolvable:$true] %s207_s11 }
  0x1f   : > { %1797 = sst [smem:[#allocation22_spill]] %s1796_s8  ;;  %s220_s14 = sshll.u32 %s1256_s13, 4  ;;  %s1391_s14 = int_to_ptr.vmem [resolvable:$true] %s220_s14 }
  0x20   : > { %s1798_s9 = scalar_select %p1379_p10, 1, 0 }
  0x21   : > { %p872_p11 = pneg %p1379_p10  ;;  %s1800_s2 = sld [smem:[#allocation28_spill]] }
  0x23   : > { %p1387_p12 = pnand %p872_p11, %p1765_p1 }
  0x25   : > { %p1005_p0 = pneg %p1387_p12 }
  0x27   : > { %s1003_s17 = scalar_lea.hbm %s1800_s2, 256 }
  0x28   : > { %p1004_p13 = scmp.ne.s32.totalorder %s1800_s2, %s1003_s17  ;;  %p1010_p7 = scmp.lt.u32.totalorder %s1003_s17, %s1800_s2 }
  0x2a   : > { %p1006_p2 = pnand %p1005_p0, %p1004_p13 }
  0x2c   : > { %p1007_p5 = pneg %p1006_p2 }
  0x2e   : > { %p1012_p9 = pnand %p1010_p7, %p1007_p5 }
  0x30   : > { %1015 = shalt.err (!%p1012_p9)
}
  0x31   : > { %s1016_s13 = scalar_lea.vmem %s208_s11, 256  ;;  %p1024_p8 = scmp.lt.s32.totalorder %s208_s11, %s208_s11 }
  0x32   : > { %p1017_p11 = scmp.ne.s32.totalorder %s208_s11, %s1016_s13  ;;  %p1025_p6 = scmp.lt.s32.totalorder %s1016_s13, %s1016_s13 }
  0x34   : > { %p1019_p1 = pnand %p1017_p11, %p1005_p0  ;;  %p1026_p4 = por %p1025_p6, %p1024_p8 }
  0x36   : > { %p1020_p3 = pneg %p1019_p1 }
  0x38   : > { %p1027_p10 = pnand %p1026_p4, %p1020_p3 }
  0x3a   : > { %1030 = shalt.err (!%p1027_p10)
}
  0x3b   : > { %s1771_s15 = smov 128   ;;  %s1773_s16 = smov 8  }
  0x3c   : > { %875 = dma.hbm_to_vmem [thread:$0]  (!%p1387_p12), %s1800_s2, 256, %s208_s11, [#allocation7], %s1771_s15, %s1771_s15, %s1773_s16  }
  0x3d   : > { %s1801_s3 = sld [smem:[#allocation29_spill]] }
  0x43   : > { %s1031_s10 = scalar_lea.hbm %s1801_s3, 1024 }
  0x44   : > { %p1032_p1 = scmp.ne.s32.totalorder %s1801_s3, %s1031_s10  ;;  %p1038_p6 = scmp.lt.u32.totalorder %s1031_s10, %s1801_s3 }
  0x46   : > { %p1034_p3 = pnand %p1032_p1, %p1005_p0 }
  0x48   : > { %p1035_p4 = pneg %p1034_p3 }
  0x4a   : > { %p1040_p8 = pnand %p1038_p6, %p1035_p4 }
  0x4c   : > { %1043 = shalt.err (!%p1040_p8)
}
  0x4d   : > { %s1044_s11 = scalar_lea.vmem %s1391_s14, 1024  ;;  %p1052_p5 = scmp.lt.s32.totalorder %s1391_s14, %s1391_s14 }
  0x4e   : > { %p1045_p10 = scmp.ne.s32.totalorder %s1391_s14, %s1044_s11  ;;  %p1053_p7 = scmp.lt.s32.totalorder %s1044_s11, %s1044_s11 }
  0x50   : > { %p1047_p13 = pnand %p1045_p10, %p1005_p0  ;;  %p1054_p9 = por %p1053_p7, %p1052_p5 }
  0x52   : > { %p1048_p2 = pneg %p1047_p13 }
  0x54   : > { %p1055_p11 = pnand %p1054_p9, %p1048_p2 }
  0x56   : > { %1058 = shalt.err (!%p1055_p11)
}
  0x57   : > { %s1259_s4 = smov 64   ;;  %s1260_s5 = smov 4  }
  0x58   : > { %878 = dma.hbm_to_vmem [thread:$0]  (!%p1387_p12), %s1801_s3, 1024, %s1391_s14, [#allocation10], %s1259_s4, %s1259_s4, %s1260_s5  }
  0x59   : > { %s34_s17 = sadd.s32 1, %s1245_s26  ;;  %s37_s18 = sadd.s32 1, %s1249_s27 }
  0x5a   : > { %p35_p0 = scmp.ge.s32.totalorder %s34_s17, 3  ;;  %s46_s30 = sadd.s32 1, %s1233_s23 }
  0x5b   : > { %p53_p1 = scmp.ne.s32.totalorder %s1233_s23, %s1229_s22  ;;  %p1779_p3 = scmp.eq.s32.totalorder %s1253_s28, 0 }
  0x5c   : > { %s1847_s17 = smov (%p35_p0, %s34_s17), 0  ;;  %s1849_s18 = smov (!%p35_p0, %s37_s18), %s1249_s27 }
  0x5d   : > { %1802 = sst [smem:[#allocation23_spill]] %s1847_s17  ;;  %s42_s10 = ssub.s32 %s1245_s26, %s1847_s17 }
  0x5e   : > { %p1456_p4 = por %p1779_p3, %p53_p1  ;;  %p39_p12 = scmp.ge.s32.totalorder %s1849_s18, 2 }
  0x5f   : > { %p1804_p6 = scmp.eq.s32.totalorder %s1353_s29, 5  ;;  %p1778_p10 = scmp.lt.s32.totalorder %s1253_s28, 6 }
  0x60   : > { %s237_s13 = sand.u32 1, %s1233_s23   ;;  %s1851_s18 = smov (%p39_p12, %s1849_s18), 0 }
  0x61   : > { %p1462_p8 = por %p1804_p6, %p53_p1  ;;  %1807 = sst [smem:[#allocation25_spill]] %s1851_s18 }
  0x62   : > { %s797_s11 = sshll.u32 %s237_s13, 4  ;;  %s1472_s4 = ssub.s32 %s1249_s27, %s1851_s18 }
  0x63   : > { %s1805_s14 = scalar_select %p1462_p8, 1, 0 }
  0x64   : > { %s43_s5 = sor.u32 %s42_s10, %s1472_s4  ;;  %s798_s21 = sshll.u32 %s1245_s26, 1 }
  0x65   : > { %1806 = sst [smem:[#allocation24_spill]] %s1805_s14  ;;  %p44_p13 = scmp.eq.s32.totalorder %s43_s5, 0 }
  0x66   : > { %s1780_s8 = smul.u32 6, %s1249_s27  ;;  %s241_s15 = scalar_lea.vmem [#allocation3], %s797_s11 }
  0x67   : > { %s250_s16 = sshll.u32 %s241_s15, 4  ;;  %p1481_p2 = pnand %p1778_p10, %p1456_p4  ;;  %s1490_s16 = int_to_ptr.vmem [resolvable:$true] %s250_s16 }
  0x68   : > { %s1486_s3 = scalar_select %p44_p13, %s1233_s23, %s46_s30  }
  0x69   : > { %s247_s18 = sadd.s32 %s1780_s8, %s798_s21  ;;  %s1810_s0 = sld [smem:[#allocation27_spill]] }
  0x6a   : > { %1809 = sst [smem:[#allocation26_spill]] %s1486_s3  ;;  %s799_s10 = sshll.u32 %s247_s18, 7 }
  0x6b   : > { %s1497_s15 = scalar_lea.sflag [#allocation4], %s237_s13  ;;  %p1061_p7 = pneg %p1481_p2 }
  0x6f   : > { %s1495_s11 = scalar_lea.hbm %s1810_s0, %s799_s10  ;;  %s1064_s14 = scalar_lea.hbm %s1810_s0, 1536 }
  0x70   : > { %s1059_s12 = scalar_lea.hbm %s1495_s11, 256  ;;  %p1065_p0 = scmp.lt.u32.totalorder %s1495_s11, %s1810_s0 }
  0x71   : > { %p1060_p5 = scmp.ne.s32.totalorder %s1495_s11, %s1059_s12  ;;  %p1066_p1 = scmp.lt.u32.totalorder %s1064_s14, %s1059_s12 }
  0x72   : > { %p1068_p12 = scmp.lt.u32.totalorder %s1059_s12, %s1495_s11 }
  0x73   : > { %p1062_p9 = pnand %p1061_p7, %p1060_p5  ;;  %p1067_p4 = por %p1066_p1, %p1065_p0 }
  0x75   : > { %p1063_p11 = pneg %p1062_p9  ;;  %p1069_p6 = por %p1068_p12, %p1067_p4 }
  0x77   : > { %p1070_p13 = pnand %p1069_p6, %p1063_p11 }
  0x79   : > { %1073 = shalt.err (!%p1070_p13)
}
  0x7a   : > { %s1074_s13 = scalar_lea.vmem %s1490_s16, 256  ;;  %s1261_s5 = smov [#allocation3]  }
  0x7b   : > { %p1075_p5 = scmp.ne.s32.totalorder %s1490_s16, %s1074_s13  ;;  %s1079_s18 = sshll.u32 %s1261_s5, 4  ;;  %s1080_s18 = int_to_ptr.vmem [resolvable:$false] %s1079_s18 }
  0x7c   : > { %s1081_s30 = scalar_lea.vmem %s1080_s18, 512  ;;  %p1082_p3 = scmp.lt.s32.totalorder %s1490_s16, %s1080_s18 }
  0x7d   : > { %p1077_p9 = pnand %p1075_p5, %p1061_p7  ;;  %p1083_p0 = scmp.lt.s32.totalorder %s1081_s30, %s1074_s13 }
  0x7f   : > { %p1078_p10 = pneg %p1077_p9  ;;  %p1084_p1 = por %p1083_p0, %p1082_p3 }
  0x81   : > { %p1085_p4 = pnand %p1084_p1, %p1078_p10 }
  0x83   : > { %1088 = shalt.err (!%p1085_p4)
}
  0x84   : > { %s1811_s12 = smov 8   ;;  %s1812_s14 = smov 128  }
  0x85   : > { %882 = dma.hbm_to_vmem [thread:$0]  (!%p1481_p2), %s1495_s11, 256, %s1490_s16, %s1497_s15, %s1812_s14, %s1812_s14, %s1811_s12  }
  0x86   : > { %s791_s21 = sadd.s32 4294967295, %s1245_s26  ;;  %s792_s2 = sadd.s32 4294967295, %s1847_s17 }
  0x87   : > { %p70_p3 = scmp.gt.s32.totalorder %s791_s21, 0  ;;  %p73_p10 = scmp.gt.s32.totalorder %s792_s2, 0 }
  0x88   : > { %s80_s10 = sadd.s32 1, %s1221_s20  ;;  %p87_p7 = scmp.ne.s32.totalorder %s1221_s20, %s1217_s19 }
  0x89   : > { %s1853_s21 = smov (!%p70_p3, %s791_s21), 0  ;;  %s1855_s2 = smov (!%p73_p10, %s792_s2), 0 }
  0x8a   : > { %s76_s13 = ssub.s32 %s1853_s21, %s1855_s2  ;;  %s260_s5 = sand.u32 1, %s1253_s28  }
  0x8b   : > { %s77_s18 = sor.u32 %s76_s13, %s1472_s4  ;;  %p1813_p11 = scmp.eq.s32.totalorder %s1253_s28, 0 }
  0x8c   : > { %p78_p6 = scmp.eq.s32.totalorder %s77_s18, 0  ;;  %s262_s30 = sand.u32 1, %s1221_s20  }
  0x8d   : > { %p89_p12 = por %p87_p7, %p1813_p11  ;;  %s800_s8 = sshll.u32 %s262_s30, 4 }
  0x8e   : > { %s802_s16 = sshll.u32 %s1853_s21, 1  ;;  %s1814_s15 = smul.u32 6, %s1249_s27 }
  0x8f   : > { %s1539_s11 = scalar_select %p78_p6, %s1221_s20, %s80_s10  }
  0x90   : > { %s273_s0 = sadd.s32 %s1814_s15, %s802_s16  ;;  %s264_s26 = scalar_lea.vmem [#allocation6], %s800_s8 }
  0x91   : > { %s803_s17 = sshll.u32 %s273_s0, 7  ;;  %s276_s3 = sshll.u32 %s264_s26, 4  ;;  %s1548_s3 = int_to_ptr.vmem [resolvable:$true] %s276_s3 }
  0x92   : > { %s1546_s24 = scalar_lea.hbm %s1759_s1, %s803_s17  ;;  %p1815_p2 = scmp.lt.s32.totalorder %s1253_s28, 6 }
  0x93   : > { %s1556_s0 = scalar_lea.sflag [#allocation7], %s260_s5  ;;  %s1089_s26 = scalar_lea.hbm %s1546_s24, 256 }
  0x94   : > { %p1552_p13 = pnand %p1815_p2, %p89_p12  ;;  %p1090_p5 = scmp.ne.s32.totalorder %s1546_s24, %s1089_s26 }
  0x95   : > { %s1094_s17 = scalar_lea.hbm %s1759_s1, 1536  ;;  %p1095_p4 = scmp.lt.u32.totalorder %s1546_s24, %s1759_s1 }
  0x96   : > { %p1091_p9 = pneg %p1552_p13  ;;  %p1096_p3 = scmp.lt.u32.totalorder %s1094_s17, %s1089_s26 }
  0x97   : > { %p1098_p7 = scmp.lt.u32.totalorder %s1089_s26, %s1546_s24 }
  0x98   : > { %p1092_p0 = pnand %p1091_p9, %p1090_p5  ;;  %p1097_p10 = por %p1096_p3, %p1095_p4 }
  0x9a   : > { %p1093_p1 = pneg %p1092_p0  ;;  %p1099_p11 = por %p1098_p7, %p1097_p10 }
  0x9c   : > { %p1100_p12 = pnand %p1099_p11, %p1093_p1 }
  0x9e   : > { %1103 = shalt.err (!%p1100_p12)
}
  0x9f   : > { %s1104_s2 = scalar_lea.vmem %s1548_s3, 256  ;;  %s1262_s10 = smov [#allocation6]  }
  0xa0   : > { %p1105_p6 = scmp.ne.s32.totalorder %s1548_s3, %s1104_s2  ;;  %s1109_s13 = sshll.u32 %s1262_s10, 4  ;;  %s1110_s13 = int_to_ptr.vmem [resolvable:$false] %s1109_s13 }
  0xa1   : > { %s1111_s5 = scalar_lea.vmem %s1110_s13, 512  ;;  %p1112_p0 = scmp.lt.s32.totalorder %s1548_s3, %s1110_s13 }
  0xa2   : > { %p1107_p2 = pnand %p1105_p6, %p1091_p9  ;;  %p1113_p4 = scmp.lt.s32.totalorder %s1111_s5, %s1104_s2 }
  0xa4   : > { %p1108_p5 = pneg %p1107_p2  ;;  %p1114_p3 = por %p1113_p4, %p1112_p0 }
  0xa6   : > { %p1115_p10 = pnand %p1114_p3, %p1108_p5 }
  0xa8   : > { %1118 = shalt.err (!%p1115_p10)
}
  0xa9   : > { %885 = dma.hbm_to_vmem [thread:$0]  (!%p1552_p13), %s1546_s24, 256, %s1548_s3, %s1556_s0, %s1812_s14, %s1812_s14, %s1811_s12  }
  0xaa   : > { %p1817_p9 = scmp.ne.s32.totalorder %s1798_s9, 0 }
  0xab   : > { %s1590_s18 = sand.u32 (!%p1817_p9), 1, %s1229_s22   ;;  %p1818_p1 = scmp.ne.s32.totalorder (!%p1817_p9), %s1794_s6, 0 }
  0xac   : > { %288 = sbr.rel (%p1817_p9) target bundleno = 489 (0x1e9), region = 40  ;;  %s805_s30 = sshll.u32 (!%p1817_p9), %s1590_s18, 4 }
  0xad   : > { %s291_s16 = scalar_lea.sflag (!%p1817_p9), [#allocation4], %s1590_s18  ;;  %s294_s15 = scalar_lea.vmem (!%p1817_p9), [#allocation3], %s805_s30 }
  0xb3   : > { %1192 = dma.done.wait (%p1818_p1), %s291_s16, 256  }
  0xb4   : > { %1194 = vsyncadd (%p1818_p1), %s291_s16, 4294967040  ;;  %s299_s3 = sand.u32 1, %s1353_s29   ;;  %s301_s24 = sand.u32 1, %s1217_s19  }
  0xb5   : > { %s1600_s9 = sshll.u32 %s301_s24, 4  ;;  %s300_s12 = scalar_lea.sflag [#allocation7], %s299_s3 }
  0xb6   : > { %s303_s14 = scalar_lea.vmem [#allocation6], %s1600_s9  ;;  %p1819_p13 = scmp.ne.s32.totalorder %s1795_s7, 0 }
  0xb8   : > { %1196 = dma.done.wait (%p1819_p13), %s300_s12, 256  }
  0xb9   : > { %1198 = vsyncadd (%p1819_p13), %s300_s12, 4294967040  ;;  %p1820_p7 = scmp.eq.s32.totalorder %s1353_s29, 0 }
  0xbb   : > { %1200 = dma.done.wait (%p1820_p7), [#allocation7], 256   ;;  %p1821_p11 = pmov %p1820_p7 }
  0xbc   : > { %p1822_p12 = pmov %p1820_p7 }
  0xbd   : > { %1202 = vsyncadd (%p1821_p11), [#allocation7], 4294967040 }
  0xbe   : > { %1204 = dma.done.wait (%p1822_p12), [#allocation10], 1024   ;;  %p1823_p6 = pmov %p1820_p7 }
  0xbf   : > { %v354_v0 = vlaneseq  ;;  %v1618_v3 = vld [vmem:[%s294_s15] sm:$0xff]  ;;  %v1620_v4 = vld [vmem:[%s294_s15 + $0x8] sm:$0xff]  ;;  %s1631_s29 = scalar_lea.vmem [#allocation11], %s805_s30  ;;  %s1824_s6 = sld [smem:[#allocation19_spill]] }
  0xc0   : > { %1206 = vsyncadd (%p1823_p6), [#allocation10], 4294966272  ;;  %v1622_v5 = vld [vmem:[#allocation8] sm:$0xff]  ;;  %v1624_v6 = vld [vmem:[#allocation8 + $0x8] sm:$0xff] }
  0xc1   : > { %v1615_v1 = vshrl.u32 %v354_v0, 7 }
  0xc3   : > { %v356_v2 = vsub.s32 0, %v1615_v1 }
  0xc5   : > { %v357_v7 = vrot.slane %v1622_v5, %v356_v2  ;;  %p810_p2 = scmp.ne.s32.totalorder %s1824_s6, 0 }
  0xc6   : > { %v1263_v10 = vmov (!%p810_p2), 0.0  }
  0xc7   : > { %v358_v8 = vmul.f32 %v357_v7, %v1618_v3  ;;  %v359_v9 = vmul.f32 %v357_v7, %v1620_v4  ;;  %363 = sbr.rel (%p810_p2) target bundleno = 206 (0xce), region = 60  ;;  %364 = vst [vmem:[#allocation2] sm:$0xff] (!%p810_p2), %v1263_v10  ;;  %365 = vst [vmem:[#allocation2 + $0x8] sm:$0xff] (!%p810_p2), %v1263_v10 }
  0xce PF: > { %s1825_s7 = sld [smem:[#allocation19_spill]] }
  0xd4   : > { %p811_p5 = scmp.le.s32.totalorder %s1825_s7, 0 }
  0xd5   : > { %v370_v11 = vld [vmem:[%s303_s14] sm:$0xff] (!%p811_p5)  ;;  %v371_v12 = vld [vmem:[%s303_s14 + $0x8] sm:$0xff] (!%p811_p5) }
  0xd6   : > { %369 = sbr.rel (%p811_p5) target bundleno = 221 (0xdd), region = 64  ;;  %372 = vst [vmem:[#allocation2] sm:$0xff] (!%p811_p5), %v370_v11  ;;  %373 = vst [vmem:[#allocation2 + $0x8] sm:$0xff] (!%p811_p5), %v371_v12 }
  0xdd PF: > { %v995_v13 = vld [vmem:[#allocation9] sm:$0xff]   ;;  %374 = vst [vmem:[#allocation2 + $0x10] sm:$0xff] %v1618_v3  ;;  %375 = vst [vmem:[#allocation2 + $0x18] sm:$0xff] %v1620_v4  ;;  %v1264_v14 = vmov 0.0   ;;  %v996_v15 = vld [vmem:[#allocation9 + $0x8] sm:$0xff]   ;;  %vm1265_vm0 = vmmov 0   ;;  %v519_v22 = vpack.c.bf16 %v1620_v4, %v1618_v3 }
  0xde   : > { %835 = vmatprep.subr.bf16.mxu0 %v1264_v14  ;;  %851 = vmatprep.mubr.msk.bf16.mxu0 %vm1265_vm0, %v1264_v14  ;;  %v997_v16 = vld [vmem:[#allocation9 + $0x10] sm:$0xff]   ;;  %v998_v17 = vld [vmem:[#allocation9 + $0x18] sm:$0xff]   ;;  %v999_v18 = vld [vmem:[#allocation9 + $0x20] sm:$0xff]   ;;  %v380_v23 = vsub.s32 1, %v1615_v1  ;;  %v390_v25 = vsub.s32 2, %v1615_v1  ;;  %v400_v30 = vsub.s32 3, %v1615_v1 }
  0xdf   : > { %836 = vmatpush3.bf16.msra.mxu0 %v995_v13  ;;  %v1000_v19 = vld [vmem:[#allocation9 + $0x28] sm:$0xff]   ;;  %v1001_v20 = vld [vmem:[#allocation9 + $0x30] sm:$0xff]   ;;  %v1002_v21 = vld [vmem:[#allocation9 + $0x38] sm:$0xff]   ;;  %v410_v37 = vsub.s32 4, %v1615_v1  ;;  %v420_v45 = vsub.s32 5, %v1615_v1  ;;  %v430_v53 = vsub.s32 6, %v1615_v1 }
  0xe0   : > { %837 = vmatprep.subr.bf16.mxu0 %v1264_v14  ;;  %v381_v24 = vrot.slane %v1622_v5, %v380_v23  ;;  %v391_v29 = vrot.slane %v1622_v5, %v390_v25  ;;  %v401_v36 = vrot.slane %v1622_v5, %v400_v30  ;;  %v440_v61 = vsub.s32 7, %v1615_v1  ;;  %s1826_s4 = sld [smem:[#allocation20_spill]]  ;;  %s1827_s0 = sld [smem:[#allocation19_spill]] }
  0xe1   : > { %v411_v44 = vrot.slane %v1622_v5, %v410_v37  ;;  %v421_v52 = vrot.slane %v1622_v5, %v420_v45  ;;  %v431_v60 = vrot.slane %v1622_v5, %v430_v53  ;;  %s1828_s8 = sld [smem:[#allocation30_spill]]  ;;  %s654_s13 = sshll.u32 %s1631_s29, 4  ;;  %s1692_s13 = int_to_ptr.vmem [resolvable:$true] %s654_s13 }
  0xe2   : > { %v441_v10 = vrot.slane %v1622_v5, %v440_v61  ;;  %s1830_s16 = sld [smem:[#allocation31_spill]]  ;;  %s639_s3 = scalar_lea.sflag [#allocation5], %s1590_s18 }
  0xe3   : > { %838 = vmatpush3.bf16.msra.mxu0 %v996_v15  ;;  %s1119_s24 = scalar_lea.vmem %s1692_s13, 256  ;;  %s1266_s9 = smov [#allocation11]  }
  0xe4   : > { %839 = vmatprep.subr.bf16.mxu0 %v1264_v14  ;;  %v1642_v26 = vld [vmem:[#allocation2 + $0xf] sm:$0xff]  ;;  %v377_v27 = vld [vmem:[#allocation2 + $0x17] sm:$0xff]  ;;  %p1120_p0 = scmp.ne.s32.totalorder %s1692_s13, %s1119_s24  ;;  %s1123_s12 = sshll.u32 %s1266_s9, 4  ;;  %s1124_s12 = int_to_ptr.vmem [resolvable:$false] %s1123_s12 }
  0xe5   : > { %v382_v28 = vmul.f32 %v381_v24, %v1642_v26  ;;  %v1647_v31 = vld [vmem:[#allocation2 + $0xe] sm:$0xff]  ;;  %v383_v32 = vmul.f32 %v381_v24, %v377_v27  ;;  %v387_v33 = vld [vmem:[#allocation2 + $0x16] sm:$0xff]  ;;  %v460_v24 = vrot.slane %v1624_v6, %v380_v23  ;;  %s1125_s14 = scalar_lea.vmem %s1124_s12, 512  ;;  %p1126_p10 = scmp.lt.s32.totalorder %s1692_s13, %s1124_s12 }
  0xe6   : > { %v392_v35 = vmul.f32 %v391_v29, %v1647_v31  ;;  %v1654_v38 = vld [vmem:[#allocation2 + $0xd] sm:$0xff]  ;;  %v393_v40 = vmul.f32 %v391_v29, %v387_v33  ;;  %v397_v41 = vld [vmem:[#allocation2 + $0x15] sm:$0xff]  ;;  %v469_v33 = vrot.slane %v1624_v6, %v390_v25  ;;  %s857_s26 = smul.u32 6, %s1826_s4  ;;  %s822_s23 = sshll.u32 %s1827_s0, 1 }
  0xe7   : > { %840 = vmatpush3.bf16.msra.mxu0 %v997_v16  ;;  %v384_v34 = vadd.f32 %v382_v28, %v358_v8  ;;  %v385_v39 = vadd.f32 %v383_v32, %v359_v9  ;;  %v402_v43 = vmul.f32 %v401_v36, %v1654_v38  ;;  %v406_v46 = vld [vmem:[#allocation2 + $0xc] sm:$0xff]  ;;  %v403_v48 = vmul.f32 %v401_v36, %v397_v41  ;;  %v407_v49 = vld [vmem:[#allocation2 + $0x14] sm:$0xff]  ;;  %p1121_p4 = pnand %p1120_p0, %p1462_p8  ;;  %p1127_p9 = scmp.lt.s32.totalorder %s1125_s14, %s1119_s24 }
  0xe8   : > { %841 = vmatprep.subr.bf16.mxu0 %v1264_v14  ;;  %v412_v51 = vmul.f32 %v411_v44, %v406_v46  ;;  %v416_v54 = vld [vmem:[#allocation2 + $0xb] sm:$0xff]  ;;  %v413_v56 = vmul.f32 %v411_v44, %v407_v49  ;;  %v417_v57 = vld [vmem:[#allocation2 + $0x13] sm:$0xff]  ;;  %v462_v36 = vmul.f32 %v460_v24, %v1642_v26  ;;  %s651_s21 = sadd.s32 %s857_s26, %s822_s23 }
  0xe9   : > { %v394_v42 = vadd.f32 %v392_v35, %v384_v34  ;;  %v395_v47 = vadd.f32 %v393_v40, %v385_v39  ;;  %v422_v59 = vmul.f32 %v421_v52, %v416_v54  ;;  %v426_v62 = vld [vmem:[#allocation2 + $0xa] sm:$0xff]  ;;  %v423_v0 = vmul.f32 %v421_v52, %v417_v57  ;;  %v427_v7 = vld [vmem:[#allocation2 + $0x12] sm:$0xff]  ;;  %v501_v57 = vld [vmem:[#allocation2 + $0x2] sm:$0xff]  ;;  %s823_s10 = sshll.u32 %s651_s21, 7  ;;  %p1122_p3 = pneg %p1121_p4 }
  0xea   : > { %v432_v9 = vmul.f32 %v431_v60, %v426_v62  ;;  %v436_v11 = vld [vmem:[#allocation2 + $0x9] sm:$0xff]  ;;  %v433_v13 = vmul.f32 %v431_v60, %v427_v7  ;;  %v478_v40 = vrot.slane %v1624_v6, %v400_v30  ;;  %s1690_s15 = scalar_lea.hbm %s1830_s16, %s823_s10  ;;  %p1128_p1 = por %p1127_p9, %p1126_p10 }
  0xeb   : > { %842 = vmatpush3.bf16.msra.mxu0 %v998_v17  ;;  %v404_v50 = vadd.f32 %v402_v43, %v394_v42  ;;  %v405_v55 = vadd.f32 %v403_v48, %v395_v47  ;;  %v442_v16 = vmul.f32 %v441_v10, %v436_v11  ;;  %v451_v17 = vrot.slane %v1624_v6, %v356_v2  ;;  %v456_v27 = vld [vmem:[#allocation2 + $0x7] sm:$0xff] }
  0xec   : > { %843 = vmatprep.subr.bf16.mxu0 %v1264_v14  ;;  %v461_v32 = vmul.f32 %v460_v24, %v456_v27  ;;  %v465_v34 = vld [vmem:[#allocation2 + $0x6] sm:$0xff]  ;;  %v471_v42 = vmul.f32 %v469_v33, %v1647_v31  ;;  %v487_v47 = vrot.slane %v1624_v6, %v410_v37  ;;  %v480_v49 = vmul.f32 %v478_v40, %v1654_v38  ;;  %p1129_p13 = pnand %p1128_p1, %p1122_p3 }
  0xed   : > { %v414_v58 = vadd.f32 %v412_v51, %v404_v50  ;;  %v415_v63 = vadd.f32 %v413_v56, %v405_v55  ;;  %v453_v5 = vmul.f32 %v451_v17, %v1618_v3  ;;  %v470_v39 = vmul.f32 %v469_v33, %v465_v34  ;;  %v474_v41 = vld [vmem:[#allocation2 + $0x5] sm:$0xff] }
  0xee   : > { %v479_v44 = vmul.f32 %v478_v40, %v474_v41  ;;  %v483_v48 = vld [vmem:[#allocation2 + $0x4] sm:$0xff]  ;;  %v496_v51 = vrot.slane %v1624_v6, %v420_v45  ;;  %v489_v30 = vmul.f32 %v487_v47, %v406_v46  ;;  %v505_v31 = vrot.slane %v1624_v6, %v430_v53  ;;  %v812_v53 = vld [vmem:[%s1828_s8] ss:$0 sm:$0xff] }
  0xef   : > { %844 = vmatpush3.bf16.msra.mxu0 %v999_v18  ;;  %v424_v8 = vadd.f32 %v422_v59, %v414_v58  ;;  %v425_v12 = vadd.f32 %v423_v0, %v415_v63  ;;  %v446_v18 = vld [vmem:[#allocation2 + $0x8] sm:$0xff]  ;;  %v488_v26 = vmul.f32 %v487_v47, %v483_v48  ;;  %v514_v38 = vrot.slane %v1624_v6, %v440_v61 }
  0xf0   : > { %845 = vmatprep.subr.bf16.mxu0 %v1264_v14  ;;  %v492_v52 = vld [vmem:[#allocation2 + $0x3] sm:$0xff]  ;;  %v498_v37 = vmul.f32 %v496_v51, %v416_v54  ;;  %v506_v60 = vmul.f32 %v505_v31, %v501_v57  ;;  %v507_v7 = vmul.f32 %v505_v31, %v426_v62 }
  0xf1   : > { %v434_v15 = vadd.f32 %v432_v9, %v424_v8  ;;  %v497_v56 = vmul.f32 %v496_v51, %v492_v52  ;;  %v510_v63 = vld [vmem:[#allocation2 + $0x1] sm:$0xff]  ;;  %v516_v9 = vmul.f32 %v514_v38, %v436_v11 }
  0xf2   : > { %v515_v8 = vmul.f32 %v514_v38, %v510_v63 }
  0xf3   : > { %846 = vmatpush3.bf16.msra.mxu0 %v1000_v19  ;;  %v435_v19 = vadd.f32 %v433_v13, %v425_v12 }
  0xf4   : > { %847 = vmatprep.subr.bf16.mxu0 %v1264_v14 }
  0xf7   : > { %848 = vmatpush3.bf16.msra.mxu0 %v1001_v20 }
  0xf8   : > { %849 = vmatprep.subr.bf16.mxu0 %v1264_v14  ;;  %v437_v14 = vld [vmem:[#allocation2 + $0x11] sm:$0xff] }
  0xf9   : > { %v443_v20 = vmul.f32 %v441_v10, %v437_v14 }
  0xfb   : > { %850 = vmatpush3.bf16.msra.mxu0 %v1002_v21  ;;  %v444_v21 = vadd.f32 %v442_v16, %v434_v15  ;;  %v445_v28 = vadd.f32 %v443_v20, %v435_v19 }
  0xfd   : > { %v455_v35 = vadd.f32 %v453_v5, %v445_v28 }
  0xfe   : > { %852 = vmatmul.mubr.bf16.vlgmr.msra.gmra.mrb[0].mxu0 %v519_v22  ;;  %v452_v22 = vmul.f32 %v451_v17, %v446_v18 }
  0xff   : > { %v464_v23 = vadd.f32 %v462_v36, %v455_v35 }
 0x100   : > { %v454_v29 = vadd.f32 %v452_v22, %v444_v21 }
 0x101   : > { %v473_v25 = vadd.f32 %v471_v42, %v464_v23 }
 0x102   : > { %v463_v2 = vadd.f32 %v461_v32, %v454_v29 }
 0x103   : > { %v482_v1 = vadd.f32 %v480_v49, %v473_v25 }
 0x104   : > { %v472_v43 = vadd.f32 %v470_v39, %v463_v2 }
 0x105   : > { %v491_v58 = vadd.f32 %v489_v30, %v482_v1 }
 0x106   : > { %v481_v50 = vadd.f32 %v479_v44, %v472_v43 }
 0x107   : > { %v500_v0 = vadd.f32 %v498_v37, %v491_v58 }
 0x108   : > { %v490_v55 = vadd.f32 %v488_v26, %v481_v50 }
 0x109   : > { %v509_v46 = vadd.f32 %v507_v7, %v500_v0 }
 0x10a   : > { %v499_v59 = vadd.f32 %v497_v56, %v490_v55 }
 0x10b   : > { %v518_v62 = vadd.f32 %v516_v9, %v509_v46 }
 0x10c   : > { %v508_v45 = vadd.f32 %v506_v60, %v499_v59 }
 0x10e   : > { %v517_v10 = vadd.f32 %v515_v8, %v508_v45 }
 0x1d1   : > { %v625_v54 = vpop.f32.mrb[0].mxu0 }
 0x1d2   : > { %v626_v6 = vadd.f32 %v812_v53, %v625_v54  ;;  %v853_v61 = vpop.f32.mrb[1].mxu0 }
 0x1d3   : > { %v628_v12 = vpop.f32.mrb[2].mxu0 }
 0x1d4   : > { %v632_v13 = vmul.f32 %v626_v6, %v517_v10  ;;  %v629_v14 = vadd.f32 %v812_v53, %v628_v12  ;;  %v854_v15 = vpop.f32.mrb[3].mxu0 }
 0x1d6   : > { %v634_v11 = vadd.f32 %v632_v13, %v1618_v3  ;;  %v633_v16 = vmul.f32 %v629_v14, %v518_v62 }
 0x1d8   : > { %636 = vst [vmem:[%s1631_s29] sm:$0xff] %v634_v11  ;;  %v635_v17 = vadd.f32 %v633_v16, %v1620_v4 }
 0x1da   : > { %637 = vst [vmem:[%s1631_s29 + $0x8] sm:$0xff] %v635_v17 }
 0x1db   : > { %1132 = shalt.err (!%p1129_p13)
}
 0x1dc   : > { %s1133_s29 = scalar_lea.hbm %s1690_s15, 256  ;;  %s1137_s4 = scalar_lea.hbm %s1830_s16, 1536 }
 0x1dd   : > { %p1134_p7 = scmp.ne.s32.totalorder %s1690_s15, %s1133_s29  ;;  %p1138_p6 = scmp.lt.u32.totalorder %s1690_s15, %s1830_s16 }
 0x1de   : > { %p1139_p2 = scmp.lt.u32.totalorder %s1137_s4, %s1133_s29  ;;  %p1141_p0 = scmp.lt.u32.totalorder %s1133_s29, %s1690_s15 }
 0x1df   : > { %p1135_p11 = pnand %p1134_p7, %p1462_p8 }
 0x1e0   : > { %p1140_p5 = por %p1139_p2, %p1138_p6 }
 0x1e1   : > { %p1136_p12 = pneg %p1135_p11 }
 0x1e2   : > { %p1142_p4 = por %p1141_p0, %p1140_p5 }
 0x1e4   : > { %p1143_p3 = pnand %p1142_p4, %p1136_p12 }
 0x1e6   : > { %1146 = shalt.err (!%p1143_p3)
}
 0x1e7   : > { %s1267_s23 = smov 128   ;;  %s1268_s25 = smov 8  }
 0x1e8   : > { %870 = dma.vmem_to_hbm [thread:$0]  (%p1462_p8), %s1692_s13, 256, %s1690_s15, %s639_s3, %s1267_s23, %s1267_s23, %s1268_s25  }
 0x1e9 PF: > { %s1831_s17 = sld [smem:[#allocation17_spill]]  ;;  %s1832_s8 = sld [smem:[#allocation22_spill]] }
 0x1ea   : > { %p895_p10 = scmp.ge.s32.totalorder %s1253_s28, 2 }
 0x1ef   : > { %s669_s21 = sand.u32 1, %s1831_s17   ;;  %p1833_p9 = scmp.ne.s32.totalorder %s1832_s8, 0 }
 0x1f0   : > { %s670_s10 = scalar_lea.sflag [#allocation5], %s669_s21 }
 0x1f1   : > { %p887_p1 = pnand %p895_p10, %p1833_p9 }
 0x1f3   : > { %1208 = dma.done.wait (!%p887_p1), %s670_s10, 256  }
 0x1f4   : > { %1210 = vsyncadd (!%p887_p1), %s670_s10, 4294967040  ;;  %s25_s28 = sadd.s32 1, %s1253_s28   ;;  %s1834_s2 = sld [smem:[#allocation18_spill]] }
 0x1f5   : > { %p22_p13 = scmp.ge.s32.totalorder %s25_s28, 8   ;;  %s1835_s23 = sld [smem:[#allocation26_spill]] }
 0x1f6   : > { %s1836_s24 = sld [smem:[#allocation21_spill]]  ;;  %s1837_s26 = sld [smem:[#allocation23_spill]] }
 0x1f7   : > { %s1838_s13 = sld [smem:[#allocation25_spill]]  ;;  %s1839_s18 = smov %s1217_s19 }
 0x1f8   : > { %s1840_s19 = smov %s1221_s20  ;;  %s1841_s20 = smov %s1539_s11 }
 0x1f9   : > { %s1842_s21 = smov %s1229_s22  ;;  %s1844_s25 = smov %s1249_s27 }
 0x1fa   : > { %s1843_s22 = smov %s1834_s2  ;;  %24 = sbr.rel (!%p22_p13) target bundleno = 18 (0x12), region = 114 }
 0x1fd   : > { %s1845_s27 = smov %s1838_s13 }
 0x201   :  { %675 = vsyncpa [#allocation4], 1 }
 0x202   :  { %677 = vsyncpa [#allocation4 + $0x1], 1 }
 0x203   :  { %678 = vsyncpa [#allocation7], 1 }
 0x204   :  { %680 = vsyncpa [#allocation7 + $0x1], 1 }
 0x205   :  { %681 = vsyncpa [#allocation10], 1 }
 0x206   :  { %682 = vsyncpa [#allocation5], 1 }
 0x207   :  { %684 = vsyncpa [#allocation5 + $0x1], 1 }

</bundles_post_ra>
